<compile_context>
chip_gen: v7x
topology: tpu7x:2x2x1
jax: 0.10.0
libtpu: 0.0.40
codegen_flags: <defaults>
</compile_context>

<pallas_src>
import jax
import jax.numpy as jnp
from jax.experimental import pallas as pl
from jax.experimental.pallas import tpu as pltpu

INPUT_DIM = 10

_SUBLANE = 8          # block sublane granularity
_LANE = 128           # lane width (used for the v7x two-TC split rounding)
_TILE_B_MAX = 16384   # 2 bufs x (16384 x 128 lanes x 4 B) for in + out ~ 32 MiB
_VMEM_LIMIT_BYTES = 48 << 20   # headroom over the ~32 MiB need, < v7x 64 MiB phys
_PALLAS_MIN_BATCH = 4096       # below this, plain XLA fused matmul wins


def _round_up(n, m):
    return ((n + m - 1) // m) * m


def _linear_kernel(x_ref, w_ref, b_ref, o_ref):
    # x_ref: (tile_b, D) f32 -- native layout, features on lanes (10 of 128)
    # w_ref: (1, D)      f32 -- resident weight row, broadcast over sublanes
    # b_ref: (1,)        f32 -- scalar bias in SMEM
    # o_ref: (tile_b, 1) f32 -- per-row result (writeback clipped to valid rows)
    prod = x_ref[...] * w_ref[...]                  # VPU broadcast multiply
    acc = jnp.sum(prod, axis=1, keepdims=True)      # XLU lane reduce -> (tile_b, 1)
    o_ref[...] = (acc + b_ref[0]).astype(o_ref.dtype)


def linear_regression_forward(x, weight, bias, *, tile_b=None, use_pallas=None):
    """y = x @ weight.T + bias.

    x: (B, D) f32, weight: (1, D) f32, bias: (1,) f32 -> (B, 1) f32.
    """
    B, D = x.shape

    if use_pallas is None:
        use_pallas = B >= _PALLAS_MIN_BATCH
    if not use_pallas:
        # Small-batch fast path: single fused XLA op beats any custom call
        # once launch + per-step overhead is counted.
        return x @ weight.T + bias

    if tile_b is None:
        tile_b = min(_TILE_B_MAX, _round_up(B, _SUBLANE))
        # Guarantee >= 2 grid steps for non-tiny batches so the "parallel"
        # batch axis actually spans both TensorCores on v7x.
        if B > 2 * _LANE:
            tile_b = min(tile_b, _round_up(pl.cdiv(B, 2), _LANE))
    tile_b = max(_SUBLANE, _round_up(tile_b, _SUBLANE))

    grid = (pl.cdiv(B, tile_b),)   # partial last block allowed; no batch padding

    return pl.pallas_call(
        _linear_kernel,
        out_shape=jax.ShapeDtypeStruct((B, 1), jnp.float32),
        grid_spec=pl.GridSpec(
            grid=grid,
            in_specs=[
                # x streamed in native (B, D) layout: the DMA reads exactly the
                # useful 40 B/row -- no transpose, no pad, no extra HBM copy.
                pl.BlockSpec((tile_b, D), lambda i: (i, 0)),
                # weight stays resident: constant block index -> no re-DMA.
                pl.BlockSpec((1, D), lambda i: (0, 0)),
                # bias: single scalar in SMEM (no padded VMEM tile).
                pl.BlockSpec(memory_space=pltpu.MemorySpace.SMEM),
            ],
            out_specs=pl.BlockSpec((tile_b, 1), lambda i: (i, 0)),
        ),
        compiler_params=pltpu.CompilerParams(
            dimension_semantics=("parallel",),      # batch tiles across TCs (v7x)
            vmem_limit_bytes=_VMEM_LIMIT_BYTES,
        ),
    )(x, weight, bias)


def init_params(key, input_dim):
    # Mimic torch.nn.Linear default init: U(-1/sqrt(fan_in), 1/sqrt(fan_in))
    kw, kb = jax.random.split(key)
    bound = 1.0 / jnp.sqrt(jnp.float32(input_dim))
    weight = jax.random.uniform(kw, (1, input_dim), jnp.float32, -bound, bound)
    bias = jax.random.uniform(kb, (1,), jnp.float32, -bound, bound)
    return weight, bias


if __name__ == "__main__":
    key = jax.random.PRNGKey(0)
    k_x, k_p, k_x2, k_x3 = jax.random.split(key, 4)

    weight, bias = init_params(k_p, INPUT_DIM)

    # 1) Pallas path forced at the module's typical tiny batch (single block).
    batch = 8
    x = jax.random.normal(k_x, (batch, INPUT_DIM), dtype=jnp.float32)
    y = linear_regression_forward(x, weight, bias, use_pallas=True)
    jax.block_until_ready(y)
    y_ref = x @ weight.T + bias
    assert y.shape == (batch, 1)
    assert jnp.allclose(y, y_ref, atol=1e-5, rtol=1e-5)

    # 2) Pallas path with an explicit small tile: multi-step grid (3 steps)
    #    with a partial last block (300 = 2*128 + 44), no batch padding.
    batch2 = 300
    x2 = jax.random.normal(k_x2, (batch2, INPUT_DIM), dtype=jnp.float32)
    y2 = linear_regression_forward(x2, weight, bias, tile_b=128, use_pallas=True)
    jax.block_until_ready(y2)
    y2_ref = x2 @ weight.T + bias
    assert y2.shape == (batch2, 1)
    assert jnp.allclose(y2, y2_ref, atol=1e-5, rtol=1e-5)

    # 3) Auto-dispatch above the threshold: hits the Pallas path with the
    #    auto tile split (2 grid steps, partial last block).
    batch3 = 4100
    x3 = jax.random.normal(k_x3, (batch3, INPUT_DIM), dtype=jnp.float32)
    y3 = linear_regression_forward(x3, weight, bias)
    jax.block_until_ready(y3)
    y3_ref = x3 @ weight.T + bias
    assert y3.shape == (batch3, 1)
    assert jnp.allclose(y3, y3_ref, atol=1e-5, rtol=1e-5)

    # 4) Auto-dispatch below the threshold: XLA fast path, same semantics.
    y4 = linear_regression_forward(x, weight, bias)
    jax.block_until_ready(y4)
    assert y4.shape == (batch, 1)
    assert jnp.allclose(y4, y_ref, atol=1e-5, rtol=1e-5)

    print("KERNEL_OK")
</pallas_src>

<mosaic_0001>
module attributes {stable_mosaic.version = 11 : i64} {
  func.func @_linear_kernel(%arg0: i32, %arg1: memref<8x10xf32, #tpu.memory_space<vmem>>, %arg2: memref<1x10xf32, #tpu.memory_space<vmem>>, %arg3: memref<1xf32, #tpu.memory_space<smem>>, %arg4: memref<8x1xf32, #tpu.memory_space<vmem>>) attributes {dimension_semantics = [#tpu.dimension_semantics<parallel>], iteration_bounds = array<i64: 1>, scalar_prefetch = 0 : i64, scratch_operands = 0 : i64, tpu.core_type = #tpu.core_type<tc>, window_params = [{transform_indices = @transform_0, window_bounds = array<i64: 8, 10>}, {pipeline_mode = #tpu.pipeline_mode<synchronous>, transform_indices = @transform_1, window_bounds = array<i64: 1, 10>}, {transform_indices = @transform_2, window_bounds = array<i64: 1>}, {transform_indices = @transform_3, window_bounds = array<i64: 8, 1>}]} {
    %c0 = arith.constant 0 : index
    %c0_0 = arith.constant 0 : index
    %0 = vector.load %arg1[%c0, %c0_0] : memref<8x10xf32, #tpu.memory_space<vmem>>, vector<8x10xf32>
    %c0_1 = arith.constant 0 : index
    %c0_2 = arith.constant 0 : index
    %1 = vector.load %arg2[%c0_1, %c0_2] : memref<1x10xf32, #tpu.memory_space<vmem>>, vector<1x10xf32>
    %2 = vector.broadcast %1 : vector<1x10xf32> to vector<8x10xf32>
    %3 = arith.mulf %0, %2 : vector<8x10xf32>
    %cst = arith.constant dense<0.000000e+00> : vector<8xf32>
    %4 = vector.multi_reduction <add>, %3, %cst [1] : vector<8x10xf32> to vector<8xf32>
    %5 = vector.shape_cast %4 : vector<8xf32> to vector<8x1xf32>
    %c0_3 = arith.constant 0 : index
    %6 = memref.load %arg3[%c0_3] : memref<1xf32, #tpu.memory_space<smem>>
    %7 = vector.broadcast %6 : f32 to vector<8x1xf32>
    %8 = arith.addf %5, %7 : vector<8x1xf32>
    %c0_4 = arith.constant 0 : index
    %c0_5 = arith.constant 0 : index
    %9 = vector.load %arg4[%c0_4, %c0_5] : memref<8x1xf32, #tpu.memory_space<vmem>>, vector<8x1xf32>
    tpu.vector_store %arg4[%c0_4, %c0_5], %8 {strides = array<i32>} : memref<8x1xf32, #tpu.memory_space<vmem>>, vector<8x1xf32>,
    return
  }
  func.func @transform_0(%arg0: i32) -> (i32, i32) {
    %c0_i32 = arith.constant 0 : i32
    %c0_i32_0 = arith.constant 0 : i32
    return %arg0, %c0_i32 : i32, i32
  }
  func.func @transform_1(%arg0: i32) -> (i32, i32) {
    %c0_i32 = arith.constant 0 : i32
    %c0_i32_0 = arith.constant 0 : i32
    %c0_i32_1 = arith.constant 0 : i32
    return %c0_i32, %c0_i32_0 : i32, i32
  }
  func.func @transform_2(%arg0: i32) -> i32 {
    %c0_i32 = arith.constant 0 : i32
    %c0_i32_0 = arith.constant 0 : i32
    return %c0_i32 : i32
  }
  func.func @transform_3(%arg0: i32) -> (i32, i32) {
    %c0_i32 = arith.constant 0 : i32
    %c0_i32_0 = arith.constant 0 : i32
    return %arg0, %c0_i32 : i32, i32
  }
}

</mosaic_0001>

<bundles_post_ra>
// kernel: tpu_custom_call.1
= control target key start
LH: loop header
LB: loop body
LE: loop exit
PB: predicated region body
PF: predicated region fallthrough
CT: control target
= control target key end

     0   :  { %9 = vsyncpa [#allocation4], 0  ;;  %s76_s12 = smov [#allocation3]   ;;  %s118_s0 = inlined_call_operand.hbm [shape: f32[8,10], index: 0, kind: input, shape index: {}]   ;;  %s119_s1 = inlined_call_operand.vmem [shape: f32[1,10], index: 1, kind: input, shape index: {}]   ;;  %s120_s2 = inlined_call_operand.<no memory space> [shape: f32[1], index: 2, kind: input, shape index: {}]   ;;  %s121_s3 = inlined_call_operand.vmem [shape: f32[8,1], index: 3, kind: output, shape index: {}]  }
   0x1   :  { %s16_s13 = sshll.u32 %s76_s12, 4  ;;  %s52_s16 = scalar_lea.hbm %s118_s0, 128  ;;  %s17_s13 = int_to_ptr.vmem [resolvable:$true] %s16_s13 }
   0x2   :  { %p53_p0 = scmp.ne.s32.totalorder %s118_s0, %s52_s16  ;;  %p56_p1 = scmp.lt.u32.totalorder %s52_s16, %s118_s0 }
   0x4   :  { %p58_p2 = pnand %p56_p1, %p53_p0 }
   0x6   :  { %61 = shalt.err (!%p58_p2)
}
   0x7   :  { %s62_s21 = scalar_lea.vmem %s17_s13, 128  ;;  %p67_p4 = scmp.lt.s32.totalorder %s17_s13, %s17_s13 }
   0x8   :  { %p63_p3 = scmp.ne.s32.totalorder %s17_s13, %s62_s21  ;;  %p68_p5 = scmp.lt.s32.totalorder %s62_s21, %s62_s21 }
   0xa   :  { %p69_p6 = por %p68_p5, %p67_p4 }
   0xc   :  { %p70_p7 = pnand %p69_p6, %p63_p3 }
   0xe   :  { %73 = shalt.err (!%p70_p7)
}
   0xf   :  { %19 = dma.hbm_to_vmem [thread:$0]  %s118_s0, 128, %s17_s13, [#allocation4]  }
  0x10   :  { %74 = dma.done.wait [#allocation4], 128  }
  0x11   :  { %75 = vsyncadd [#allocation4], 4294967168  ;;  %v27_v0 = vld [vmem:[#allocation3] sm:$0xff]  ;;  %vm36_vm0 = vcmask 80896   ;;  %v41_v4 = vstv %s120_s2  ;;  %vm43_vm1 = vcmask 7168  }
  0x12   :  { %v50_v1 = vld [vmem:[%s119_s1] ss:$0 sm:$0xff] }
  0x13   :  { %v35_v2 = vmul.f32 %v50_v1, %v27_v0 }
  0x15   :  { %v37_v3 = vsel %vm36_vm0, %v35_v2, 0.0 }
  0x16   :  { %38 = vadd.xlane.f32.xlu0 %v37_v3 }
  0xa3   :  { %v39_v5 = vpop.xlane.xlu0 %38 }
  0xa4   :  { %v42_v6 = vadd.f32 %v41_v4, %v39_v5 }
  0xa6   :  { %44 = vst.msk [vmem:[%s121_s3] sm:$0xff] %vm43_vm1, %v42_v6 }
  0xa7   :  { %49 = vsyncpa [#allocation4], 1 }

</bundles_post_ra>
